<compile_context>
chip_gen: v7x
topology: tpu7x:2x2x1
jax: 0.10.0
libtpu: 0.0.40
codegen_flags: <defaults>
</compile_context>

<pallas_src>
import functools

import jax
import jax.numpy as jnp
from jax.experimental import pallas as pl
from jax.experimental.pallas import tpu as pltpu


def _round_up(x, m):
    return ((x + m - 1) // m) * m


def _pe_kernel(w1t_ref, b1t_ref, w2t_ref, b2t_ref, o_ref, *, n, tile_n):
    # w1t_ref: (H, 1)   first linear weight, transposed
    # b1t_ref: (H, 1)
    # w2t_ref: (C, H)   second linear weight, transposed
    # b2t_ref: (C, 1)
    # o_ref:   (C, TILE_N)   lane-dense output tile (lanes = flat position)
    i = pl.program_id(0)

    # Global flat-position index for this tile (exact in int32), then the
    # affine linspace map t = -1 + 2*idx/(n-1).
    local = jax.lax.broadcasted_iota(jnp.int32, (1, tile_n), 1)    # (1, TILE_N)
    gidx = i * tile_n + local                                      # (1, TILE_N)
    scale = 2.0 / float(max(n - 1, 1))
    t = gidx.astype(jnp.float32) * scale - 1.0                     # (1, TILE_N)

    # Linear(1 -> H) as an outer product on the VPU, then ReLU.
    hidden = w1t_ref[...] * t + b1t_ref[...]                       # (H, TILE_N)
    hidden = jnp.maximum(hidden, 0.0)

    # Linear(H -> C) on the MXU, output already (C, TILE_N).
    out = jnp.dot(w2t_ref[...], hidden,
                  preferred_element_type=jnp.float32)              # (C, TILE_N)
    o_ref[...] = (out + b2t_ref[...]).astype(o_ref.dtype)


def flat_position_encode(b, h, w, params, *, tile_n=512):
    """Returns (b, C, h, w) float32, matching the PyTorch module."""
    w1, b1, w2, b2 = params          # w1:(1,H)  b1:(H,)  w2:(H,C)  b2:(C,)
    H = w1.shape[1]
    C = w2.shape[1]
    n = h * w

    # Lane-dense tiling of the flat position axis.
    tile_n = min(tile_n, _round_up(n, 128))
    tile_n = _round_up(tile_n, 128)
    n_pad = _round_up(n, tile_n)
    num_tiles = n_pad // tile_n

    # Pre-transpose parameters once (tiny, stays resident in VMEM).
    w1t = w1.T.astype(jnp.float32)          # (H, 1)
    b1t = b1.reshape(H, 1).astype(jnp.float32)
    w2t = w2.T.astype(jnp.float32)          # (C, H)
    b2t = b2.reshape(C, 1).astype(jnp.float32)

    kernel = functools.partial(_pe_kernel, n=n, tile_n=tile_n)

    flat = pl.pallas_call(
        kernel,
        out_shape=jax.ShapeDtypeStruct((C, n_pad), jnp.float32),
        grid=(num_tiles,),
        in_specs=[
            pl.BlockSpec((H, 1), lambda i: (0, 0)),
            pl.BlockSpec((H, 1), lambda i: (0, 0)),
            pl.BlockSpec((C, H), lambda i: (0, 0)),
            pl.BlockSpec((C, 1), lambda i: (0, 0)),
        ],
        out_specs=pl.BlockSpec((C, tile_n), lambda i: (0, i)),
        compiler_params=pltpu.CompilerParams(
            dimension_semantics=("parallel",)),
    )(w1t, b1t, w2t, b2t)

    # Drop padded positions; (C, h*w) -> (1, C, h, w) is a pure reshape
    # (no transpose pass). Batch repeat stays a lazy broadcast.
    flat = flat[:, :n] if n_pad != n else flat
    out = flat.reshape(C, h, w)[None]                  # (1, C, h, w)
    return jnp.broadcast_to(out, (b, C, h, w))


def init_params(key, C):
    """Deterministic init matching nn.Linear(1, C//2) and nn.Linear(C//2, C)."""
    H = C // 2
    k1, k2, k3, k4 = jax.random.split(key, 4)
    # PyTorch default: U(-1/sqrt(fan_in), 1/sqrt(fan_in))
    lim1 = 1.0  # fan_in = 1
    w1 = jax.random.uniform(k1, (1, H), jnp.float32, -lim1, lim1)
    b1 = jax.random.uniform(k2, (H,), jnp.float32, -lim1, lim1)
    lim2 = 1.0 / (H ** 0.5)
    w2 = jax.random.uniform(k3, (H, C), jnp.float32, -lim2, lim2)
    b2 = jax.random.uniform(k4, (C,), jnp.float32, -lim2, lim2)
    return (w1, b1, w2, b2)


def _reference(b, h, w, params):
    w1, b1, w2, b2 = params
    t = jnp.linspace(-1.0, 1.0, h * w, dtype=jnp.float32).reshape(-1, 1)
    y = jnp.maximum(t @ w1 + b1[None, :], 0.0)
    y = y @ w2 + b2[None, :]
    C = w2.shape[1]
    out = y.reshape(1, h, w, C).transpose(0, 3, 1, 2)
    return jnp.broadcast_to(out, (b, C, h, w))


if __name__ == "__main__":
    B, C, Hsp, Wsp = 2, 32, 16, 16
    key = jax.random.PRNGKey(0)
    params = init_params(key, C)

    out = flat_position_encode(B, Hsp, Wsp, params)
    out = jax.block_until_ready(out)

    ref = _reference(B, Hsp, Wsp, params)
    assert out.shape == (B, C, Hsp, Wsp), out.shape
    assert jnp.allclose(out, ref, atol=1e-5, rtol=1e-5), \
        float(jnp.max(jnp.abs(out - ref)))

    print("KERNEL_OK")
</pallas_src>

<mosaic_0001>
module attributes {stable_mosaic.version = 11 : i64} {
  func.func @_pe_kernel(%arg0: i32, %arg1: memref<16x1xf32, #tpu.memory_space<vmem>>, %arg2: memref<16x1xf32, #tpu.memory_space<vmem>>, %arg3: memref<32x16xf32, #tpu.memory_space<vmem>>, %arg4: memref<32x1xf32, #tpu.memory_space<vmem>>, %arg5: memref<32x256xf32, #tpu.memory_space<vmem>>) attributes {dimension_semantics = [#tpu.dimension_semantics<parallel>], iteration_bounds = array<i64: 1>, scalar_prefetch = 0 : i64, scratch_operands = 0 : i64, tpu.core_type = #tpu.core_type<tc>, window_params = [{pipeline_mode = #tpu.pipeline_mode<synchronous>, transform_indices = @transform_0, window_bounds = array<i64: 16, 1>}, {pipeline_mode = #tpu.pipeline_mode<synchronous>, transform_indices = @transform_1, window_bounds = array<i64: 16, 1>}, {pipeline_mode = #tpu.pipeline_mode<synchronous>, transform_indices = @transform_2, window_bounds = array<i64: 32, 16>}, {pipeline_mode = #tpu.pipeline_mode<synchronous>, transform_indices = @transform_3, window_bounds = array<i64: 32, 1>}, {transform_indices = @transform_4, window_bounds = array<i64: 32, 256>}]} {
    %0 = tpu.iota {dimensions = array<i32: 1>} : vector<1x256xi32>
    %c256_i32 = arith.constant 256 : i32
    %1 = arith.muli %arg0, %c256_i32 : i32
    %2 = vector.broadcast %1 : i32 to vector<1x256xi32>
    %3 = arith.addi %2, %0 : vector<1x256xi32>
    %4 = arith.sitofp %3 : vector<1x256xi32> to vector<1x256xf32>
    %cst = arith.constant 0.00784313772 : f32
    %5 = vector.broadcast %cst : f32 to vector<1x256xf32>
    %6 = arith.mulf %4, %5 : vector<1x256xf32>
    %cst_0 = arith.constant 1.000000e+00 : f32
    %7 = vector.broadcast %cst_0 : f32 to vector<1x256xf32>
    %8 = arith.subf %6, %7 : vector<1x256xf32>
    %c0 = arith.constant 0 : index
    %c0_1 = arith.constant 0 : index
    %9 = vector.load %arg1[%c0, %c0_1] : memref<16x1xf32, #tpu.memory_space<vmem>>, vector<16x1xf32>
    %10 = vector.broadcast %9 : vector<16x1xf32> to vector<16x256xf32>
    %11 = vector.broadcast %8 : vector<1x256xf32> to vector<16x256xf32>
    %12 = arith.mulf %10, %11 : vector<16x256xf32>
    %c0_2 = arith.constant 0 : index
    %c0_3 = arith.constant 0 : index
    %13 = vector.load %arg2[%c0_2, %c0_3] : memref<16x1xf32, #tpu.memory_space<vmem>>, vector<16x1xf32>
    %14 = vector.broadcast %13 : vector<16x1xf32> to vector<16x256xf32>
    %15 = arith.addf %12, %14 : vector<16x256xf32>
    %cst_4 = arith.constant 0.000000e+00 : f32
    %16 = vector.broadcast %cst_4 : f32 to vector<16x256xf32>
    %17 = arith.maximumf %15, %16 : vector<16x256xf32>
    %c0_5 = arith.constant 0 : index
    %c0_6 = arith.constant 0 : index
    %18 = vector.load %arg3[%c0_5, %c0_6] : memref<32x16xf32, #tpu.memory_space<vmem>>, vector<32x16xf32>
    %cst_7 = arith.constant dense<0.000000e+00> : vector<32x256xf32>
    %19 = tpu.matmul %18, %17, %cst_7 {dimension_numbers = #tpu.dot_dimension_numbers<[1], [0], [0], [1], [0, 0, 1, 1], [], []>} : vector<32x16xf32>, vector<16x256xf32>, vector<32x256xf32> -> vector<32x256xf32>
    %c0_8 = arith.constant 0 : index
    %c0_9 = arith.constant 0 : index
    %20 = vector.load %arg4[%c0_8, %c0_9] : memref<32x1xf32, #tpu.memory_space<vmem>>, vector<32x1xf32>
    %21 = vector.broadcast %20 : vector<32x1xf32> to vector<32x256xf32>
    %22 = arith.addf %19, %21 : vector<32x256xf32>
    %c0_10 = arith.constant 0 : index
    %c0_11 = arith.constant 0 : index
    %23 = vector.load %arg5[%c0_10, %c0_11] : memref<32x256xf32, #tpu.memory_space<vmem>>, vector<32x256xf32>
    tpu.vector_store %arg5[%c0_10, %c0_11], %22 {strides = array<i32>} : memref<32x256xf32, #tpu.memory_space<vmem>>, vector<32x256xf32>,
    return
  }
  func.func @transform_0(%arg0: i32) -> (i32, i32) {
    %c0_i32 = arith.constant 0 : i32
    %c0_i32_0 = arith.constant 0 : i32
    %c0_i32_1 = arith.constant 0 : i32
    return %c0_i32, %c0_i32_0 : i32, i32
  }
  func.func @transform_1(%arg0: i32) -> (i32, i32) {
    %c0_i32 = arith.constant 0 : i32
    %c0_i32_0 = arith.constant 0 : i32
    %c0_i32_1 = arith.constant 0 : i32
    return %c0_i32, %c0_i32_0 : i32, i32
  }
  func.func @transform_2(%arg0: i32) -> (i32, i32) {
    %c0_i32 = arith.constant 0 : i32
    %c0_i32_0 = arith.constant 0 : i32
    %c0_i32_1 = arith.constant 0 : i32
    return %c0_i32, %c0_i32_0 : i32, i32
  }
  func.func @transform_3(%arg0: i32) -> (i32, i32) {
    %c0_i32 = arith.constant 0 : i32
    %c0_i32_0 = arith.constant 0 : i32
    %c0_i32_1 = arith.constant 0 : i32
    return %c0_i32, %c0_i32_0 : i32, i32
  }
  func.func @transform_4(%arg0: i32) -> (i32, i32) {
    %c0_i32 = arith.constant 0 : i32
    %c0_i32_0 = arith.constant 0 : i32
    return %c0_i32, %arg0 : i32, i32
  }
}

</mosaic_0001>

<bundles_post_ra>
// kernel: tpu_custom_call.1
= control target key start
LH: loop header
LB: loop body
LE: loop exit
PB: predicated region body
PF: predicated region fallthrough
CT: control target
= control target key end

     0   :  { %v264_v2 = vmov 0   ;;  %s342_s0 = inlined_call_operand.vmem [shape: f32[16,1], index: 0, kind: input, shape index: {}]   ;;  %s343_s1 = inlined_call_operand.vmem [shape: f32[16,1], index: 1, kind: input, shape index: {}]   ;;  %s344_s2 = inlined_call_operand.vmem [shape: f32[32,16], index: 2, kind: input, shape index: {}]   ;;  %s345_s3 = inlined_call_operand.vmem [shape: f32[32,1], index: 3, kind: input, shape index: {}]   ;;  %s346_s4 = inlined_call_operand.hbm [shape: f32[32,256], index: 4, kind: output, shape index: {}]  }
   0x1   :  { %v47_v0 = vld [vmem:[%s343_s1] sm:$0xff]  ;;  %239 = vset.pattern.permute.xlu1 %v264_v2  ;;  %238 = vset.pattern.permute.xlu0 %v264_v2 }
   0x2   :  { %v31_v1 = vld [vmem:[%s342_s0] sm:$0xff]  ;;  %51 = vperm.xlu1 %239, %v47_v0  }
   0x3   :  { %35 = vperm.xlu0 %238, %v31_v1  }
   0x4   :  { %9 = vsyncpa [#allocation3], 0  ;;  %v48_v3 = vld [vmem:[%s343_s1 + $0x8] sm:$0xff]  ;;  %v71_v6 = vld [vmem:[%s345_s3] sm:$0xff]  ;;  %v265_v9 = vmov 0.0   ;;  %v18_v10 = vlaneseq  ;;  %vm95_vm0 = vcmask 130048  }
   0x5   :  { %v32_v4 = vld [vmem:[%s342_s0 + $0x8] sm:$0xff]  ;;  %v74_v7 = vld [vmem:[%s345_s3 + $0x18] sm:$0xff]  ;;  %v73_v8 = vld [vmem:[%s345_s3 + $0x10] sm:$0xff]  ;;  %172 = vmatprep.mubr.f32.mxu0 %v265_v9  ;;  %184 = vmatprep.mubr.f32.mxu1 %v265_v9  ;;  %s266_s10 = smov [#allocation2]  }
   0x6   :  { %56 = vperm.xlu1 %239, %v48_v3   ;;  %v72_v5 = vld [vmem:[%s345_s3 + $0x8] sm:$0xff]  ;;  %v19_v11 = vand.u32 127, %v18_v10  ;;  %v67_v37 = vld [vmem:[%s344_s2] sm:$0xff]  ;;  %v69_v38 = vld [vmem:[%s344_s2 + $0x10] sm:$0xff]  ;;  %s210_s11 = sshll.u32 %s266_s10, 4  ;;  %s211_s11 = int_to_ptr.vmem [resolvable:$true] %s210_s11 }
   0x7   :  { %40 = vperm.xlu0 %238, %v32_v4   ;;  %v68_v39 = vld [vmem:[%s344_s2 + $0x8] sm:$0xff]  ;;  %v70_v40 = vld [vmem:[%s344_s2 + $0x18] sm:$0xff]  ;;  %s240_s2 = scalar_lea.vmem %s211_s11, 1024  ;;  %p245_p1 = scmp.lt.s32.totalorder %s211_s11, %s211_s11 }
   0x8   :  { %v20_v12 = vadd.s32 128, %v19_v11  ;;  %v25_v13 = vcvt.s32.f32 %v19_v11  ;;  %p241_p0 = scmp.ne.s32.totalorder %s211_s11, %s240_s2  ;;  %p246_p2 = scmp.lt.s32.totalorder %s240_s2, %s240_s2 }
   0xa   :  { %82 = vperm.xlu1 %239, %v72_v5   ;;  %v26_v14 = vcvt.s32.f32 %v20_v12  ;;  %v27_v15 = vmul.f32 0.007843138, %v25_v13  ;;  %p247_p3 = por %p246_p2, %p245_p1 }
   0xb   :  { %77 = vperm.xlu0 %238, %v71_v6  }
   0xc   :  { %v28_v16 = vmul.f32 0.007843138, %v26_v14  ;;  %v221_v17 = vadd.f32 -1.0, %v27_v15  ;;  %p248_p4 = pnand %p247_p3, %p241_p0 }
   0xe   :  { %92 = vperm.xlu1 %239, %v74_v7   ;;  %v222_v18 = vadd.f32 -1.0, %v28_v16 }
   0xf   :  { %87 = vperm.xlu0 %238, %v73_v8  }
  0x81   :  { %v52_v19 = vpop.permute.xlu1 %51 }
  0x82   :  { %v36_v20 = vpop.permute.xlu0 %35 }
  0x83   :  { %v43_v21 = vmul.f32 %v221_v17, %v36_v20  ;;  %v44_v22 = vmul.f32 %v222_v18, %v36_v20 }
  0x85   :  { %v59_v24 = vadd.f32 %v52_v19, %v43_v21  ;;  %v60_v25 = vadd.f32 %v52_v19, %v44_v22  ;;  %v57_v28 = vpop.permute.xlu1 %56 }
  0x86   :  { %v41_v23 = vpop.permute.xlu0 %40 }
  0x87   :  { %v45_v26 = vmul.f32 %v221_v17, %v41_v23  ;;  %v46_v27 = vmul.f32 %v222_v18, %v41_v23  ;;  %v64_v31 = vmax.f32 %v60_v25, 0.0  ;;  %v63_v33 = vmax.f32 %v59_v24, 0.0 }
  0x89   :  { %v61_v29 = vadd.f32 %v57_v28, %v45_v26  ;;  %v62_v30 = vadd.f32 %v57_v28, %v46_v27  ;;  %v83_v42 = vpop.permute.xlu1 %82 }
  0x8a   :  { %v78_v41 = vpop.permute.xlu0 %77 }
  0x8b   :  { %v66_v32 = vmax.f32 %v62_v30, 0.0  ;;  %v65_v34 = vmax.f32 %v61_v29, 0.0 }
  0x8d   :  { %v227_v35 = vpack.c.bf16 %v66_v32, %v64_v31  ;;  %v229_v36 = vpack.c.bf16 %v65_v34, %v63_v33  ;;  %v93_v52 = vpop.permute.xlu1 %92 }
  0x8e   :  { %v88_v43 = vpop.permute.xlu0 %87 }
  0x8f   :  { %228 = vmatprep.subr.bf16.mxu0 %v227_v35  ;;  %231 = vmatprep.subr.bf16.mxu1 %v227_v35 }
  0x90   :  { %230 = vmatpush1.bf16.msra.mxu0 %v229_v36  ;;  %232 = vmatpush1.bf16.msra.mxu1 %v229_v36 }
  0x93   :  { %223 = vmatmul.mubr.msk.f32.vlgmr.msra.gmra.mrb[0].mxu0 %vm95_vm0, %v67_v37  ;;  %225 = vmatmul.mubr.msk.f32.vlgmr.msra.gmra.mrb[0].mxu1 %vm95_vm0, %v69_v38 }
  0x94   :  { %178 = vmatprep.mubr.f32.mxu0 %v265_v9  ;;  %190 = vmatprep.mubr.f32.mxu1 %v265_v9 }
  0x97   :  { %224 = vmatmul.mubr.msk.f32.gmra.mrb[2].mxu0 %vm95_vm0, %v68_v39  ;;  %226 = vmatmul.mubr.msk.f32.gmra.mrb[2].mxu1 %vm95_vm0, %v70_v40 }
 0x166   :  { %v174_v44 = vpop.f32.mrb[0].mxu0  ;;  %v186_v45 = vpop.f32.mrb[0].mxu1 }
 0x167   :  { %v175_v46 = vadd.f32 %v174_v44, %v78_v41  ;;  %v187_v47 = vadd.f32 %v186_v45, %v88_v43  ;;  %v176_v48 = vpop.f32.mrb[1].mxu0  ;;  %v188_v49 = vpop.f32.mrb[1].mxu1 }
 0x168   :  { %v177_v50 = vadd.f32 %v176_v48, %v78_v41  ;;  %v189_v51 = vadd.f32 %v188_v49, %v88_v43 }
 0x169   :  { %197 = vst [vmem:[#allocation2] sm:$0xff] %v175_v46  ;;  %201 = vst [vmem:[#allocation2 + $0x20] sm:$0xff] %v187_v47 }
 0x16a   :  { %198 = vst [vmem:[#allocation2 + $0x8] sm:$0xff] %v177_v50  ;;  %202 = vst [vmem:[#allocation2 + $0x28] sm:$0xff] %v189_v51  ;;  %v180_v53 = vpop.f32.mrb[2].mxu0  ;;  %v192_v54 = vpop.f32.mrb[2].mxu1 }
 0x16b   :  { %v181_v55 = vadd.f32 %v180_v53, %v83_v42  ;;  %v193_v56 = vadd.f32 %v192_v54, %v93_v52  ;;  %v182_v57 = vpop.f32.mrb[3].mxu0  ;;  %v194_v58 = vpop.f32.mrb[3].mxu1 }
 0x16c   :  { %v183_v59 = vadd.f32 %v182_v57, %v83_v42  ;;  %v195_v60 = vadd.f32 %v194_v58, %v93_v52 }
 0x16d   :  { %199 = vst [vmem:[#allocation2 + $0x10] sm:$0xff] %v181_v55  ;;  %203 = vst [vmem:[#allocation2 + $0x30] sm:$0xff] %v193_v56 }
 0x16e   :  { %200 = vst [vmem:[#allocation2 + $0x18] sm:$0xff] %v183_v59  ;;  %204 = vst [vmem:[#allocation2 + $0x38] sm:$0xff] %v195_v60 }
 0x16f   :  { %251 = shalt.err (!%p248_p4)
}
 0x170   :  { %s252_s14 = scalar_lea.hbm %s346_s4, 1024 }
 0x171   :  { %p253_p5 = scmp.ne.s32.totalorder %s346_s4, %s252_s14  ;;  %p256_p6 = scmp.lt.u32.totalorder %s252_s14, %s346_s4 }
 0x173   :  { %p258_p7 = pnand %p256_p6, %p253_p5 }
 0x175   :  { %261 = shalt.err (!%p258_p7)
}
 0x176   :  { %s267_s19 = smov 256   ;;  %s268_s20 = smov 16  }
 0x177   :  { %216 = dma.vmem_to_hbm [thread:$0]  %s211_s11, 1024, %s346_s4, [#allocation3], %s267_s19, %s267_s19, %s268_s20  }
 0x178   :  { %262 = dma.done.wait [#allocation3], 1024  }
 0x179   :  { %263 = vsyncadd [#allocation3], 4294966272 }
 0x17a   :  { %220 = vsyncpa [#allocation3], 1 }

</bundles_post_ra>
